<compile_context>
chip_gen: v5e
topology: v5e:2x2
jax: 0.10.0
libtpu: 0.0.40
codegen_flags: <defaults>
</compile_context>

<pallas_src>
import functools

import jax
import jax.numpy as jnp
from jax.experimental import pallas as pl
from jax.experimental.pallas import tpu as pltpu

KERNEL = 4        # Conv1d kernel width in the PyTorch module
A_PAD = 128       # lane-dense padded width of the logits / output
NEG_INF = -1e30   # bias for padded logit lanes -> exp underflows to 0


# --------------------------------------------------------------------------- #
# Kernel
# --------------------------------------------------------------------------- #
def actor_kernel(x_ref, w_all_ref, wfc_ref, bfc_ref, wout_ref, bout_ref, out_ref):
    dot = lambda a, b: jnp.dot(a, b, preferred_element_type=jnp.float32)

    # stage 1: every scalar-FC and Conv1d branch as one banded/block-diag matmul
    #          (branch biases were folded into W_all via the trailing ones column)
    feat = jnp.maximum(dot(x_ref[...], w_all_ref[...]), 0.0)          # f32 (Bt, F)

    # stage 2: fullyConnected + ReLU (bf16 operands, f32 accumulate/bias/relu)
    h = jnp.maximum(dot(feat.astype(wfc_ref.dtype), wfc_ref[...]) + bfc_ref[...],
                    0.0)                                              # f32 (Bt, n_fc1)

    # stage 3: output layer + softmax over the (lane-padded) action axis
    logits = dot(h.astype(wout_ref.dtype), wout_ref[...]) + bout_ref[...]  # f32 (Bt, A_PAD)
    m = jnp.max(logits, axis=-1, keepdims=True)
    e = jnp.exp(logits - m)
    s = jnp.sum(e, axis=-1, keepdims=True)
    # TODO(synk): if downstream takes log(probs) for a PG loss, switch to an exact
    # divide (or return log-softmax); approx reciprocal sums to 1 only to ~1e-4.
    out_ref[...] = e * pl.reciprocal(s, approx=True)


# --------------------------------------------------------------------------- #
# One-time weight packing (cache the result per parameter set)
# --------------------------------------------------------------------------- #
def _band_block(wconv, Lb, Pb):
    """(Lb, n_conv*Pb) banded matrix so  x(B,Lb) @ band  equals the flattened
    Conv1d(1, n_conv, 4) output in torch flatten order (column index j*Pb + p)."""
    w = wconv[:, 0, :]                                # (n_conv, KERNEL)
    l = jnp.arange(Lb)[:, None]
    p = jnp.arange(Pb)[None, :]
    k = l - p                                         # (Lb, Pb)
    valid = (k >= 0) & (k < KERNEL)
    kk = jnp.clip(k, 0, KERNEL - 1)
    g = w[:, kk]                                      # (n_conv, Lb, Pb)
    g = jnp.where(valid[None, :, :], g, 0.0)
    return jnp.transpose(g, (1, 0, 2)).reshape(Lb, -1)


def pack_actor_weights(params, state_dim, action_dim):
    """Build the kernel's packed weight operands once per parameter set."""
    L = state_dim[1]
    n_conv = params['tConv1d.weight'].shape[0]
    n_fc = params['bufferFc.weight'].shape[0]
    n_fc1 = params['fullyConnected.weight'].shape[0]
    P = L - KERNEL + 1
    Pc = action_dim - KERNEL + 1
    F = 2 * n_conv * P + 3 * n_fc + n_conv * Pc       # numFcInput
    R = 3 + 2 * L + action_dim + 1                    # packed xall row width

    # torch concat order offsets: [bitrate, buffer, t, d, c, leftChunk]
    o_br, o_bf = 0, n_fc
    o_t = 2 * n_fc
    o_d = o_t + n_conv * P
    o_c = o_d + n_conv * P
    o_lc = o_c + n_conv * Pc

    W_all = jnp.zeros((R, F), jnp.float32)
    W_all = W_all.at[0, o_br:o_br + n_fc].set(params['bitrateFc.weight'][:, 0])
    W_all = W_all.at[1, o_bf:o_bf + n_fc].set(params['bufferFc.weight'][:, 0])
    W_all = W_all.at[2, o_lc:o_lc + n_fc].set(params['leftChunkFc.weight'][:, 0])
    W_all = W_all.at[3:3 + L, o_t:o_t + n_conv * P].set(
        _band_block(params['tConv1d.weight'], L, P))
    W_all = W_all.at[3 + L:3 + 2 * L, o_d:o_d + n_conv * P].set(
        _band_block(params['dConv1d.weight'], L, P))
    W_all = W_all.at[3 + 2 * L:3 + 2 * L + action_dim, o_c:o_c + n_conv * Pc].set(
        _band_block(params['cConv1d.weight'], action_dim, Pc))

    b_all = jnp.zeros((F,), jnp.float32)
    b_all = b_all.at[o_br:o_br + n_fc].set(params['bitrateFc.bias'])
    b_all = b_all.at[o_bf:o_bf + n_fc].set(params['bufferFc.bias'])
    b_all = b_all.at[o_lc:o_lc + n_fc].set(params['leftChunkFc.bias'])
    b_all = b_all.at[o_t:o_t + n_conv * P].set(jnp.repeat(params['tConv1d.bias'], P))
    b_all = b_all.at[o_d:o_d + n_conv * P].set(jnp.repeat(params['dConv1d.bias'], P))
    b_all = b_all.at[o_c:o_c + n_conv * Pc].set(jnp.repeat(params['cConv1d.bias'], Pc))
    W_all = W_all.at[R - 1, :].set(b_all)             # picked up by the ones column

    WfcT = params['fullyConnected.weight'].T          # (F, n_fc1)
    b_fc = params['fullyConnected.bias'][None, :]     # (1, n_fc1) -- stays f32
    WoutT = jnp.zeros((n_fc1, A_PAD), jnp.float32).at[:, :action_dim].set(
        params['outputLayer.weight'].T)
    b_out = jnp.full((1, A_PAD), NEG_INF, jnp.float32).at[0, :action_dim].set(
        params['outputLayer.bias'])                   # stays f32 (keeps -1e30 exact)

    # Matmul operands in bf16 (MXU fast path on v5e/v6e/v7x); biases stay f32.
    packed = (W_all.astype(jnp.bfloat16),
              WfcT.astype(jnp.bfloat16),
              b_fc.astype(jnp.float32),
              WoutT.astype(jnp.bfloat16),
              b_out.astype(jnp.float32))
    return jax.tree_util.tree_map(jax.device_put, packed)


# --------------------------------------------------------------------------- #
# Per-call forward (only packs xall; weights come pre-packed)
# --------------------------------------------------------------------------- #
def actor_forward(packed, x, action_dim, b_tile_max=512):
    """x: (B, 6, L) float32, PyTorch NCW layout. Returns softmax probs (B, a_dim)."""
    W_all, WfcT, b_fc, WoutT, b_out = packed
    B, _, L = x.shape
    R, F = W_all.shape
    n_fc1 = WfcT.shape[1]

    # ---- packed input rows: [br, bf, lc, xt(L), xd(L), xc(a_dim), 1] --------
    br = x[:, 0, L - 1:L]
    bf = x[:, 1, L - 1:L]
    lc = x[:, 5, L - 1:L]
    xt = x[:, 2, :]
    xd = x[:, 3, :]
    xc = x[:, 4, :action_dim]
    ones = jnp.ones((B, 1), jnp.float32)
    xall = jnp.concatenate([br, bf, lc, xt, xd, xc, ones], axis=1)   # (B, R) f32

    # batch tile: multiple of 16 (bf16 sublane pack), capped for scoped VMEM
    b_tile = min(b_tile_max, -(-B // 16) * 16)
    b_tile = max(16, (b_tile // 16) * 16)
    grid = -(-B // b_tile)
    B_pad = grid * b_tile
    xall = jnp.zeros((B_pad, R), jnp.float32).at[:B].set(xall).astype(jnp.bfloat16)

    # ---- cost hint for the XLA scheduler -------------------------------------
    flops = 2 * B_pad * (R * F + F * n_fc1 + n_fc1 * A_PAD)
    transcendentals = B_pad * A_PAD
    bytes_accessed = (B_pad * R * 2 + R * F * 2 + F * n_fc1 * 2 + n_fc1 * A_PAD * 2
                      + n_fc1 * 4 + A_PAD * 4 + B_pad * A_PAD * 4)

    fn = pl.pallas_call(
        actor_kernel,
        out_shape=jax.ShapeDtypeStruct((B_pad, A_PAD), jnp.float32),
        grid=(grid,),
        in_specs=[
            pl.BlockSpec((b_tile, R), lambda i: (i, 0)),        # xall: tiled over batch
            pl.BlockSpec((R, F), lambda i: (0, 0)),             # W_all: resident
            pl.BlockSpec((F, n_fc1), lambda i: (0, 0)),         # WfcT: resident
            pl.BlockSpec((1, n_fc1), lambda i: (0, 0)),         # b_fc: resident
            pl.BlockSpec((n_fc1, A_PAD), lambda i: (0, 0)),     # WoutT: resident
            pl.BlockSpec((1, A_PAD), lambda i: (0, 0)),         # b_out: resident
        ],
        out_specs=pl.BlockSpec((b_tile, A_PAD), lambda i: (i, 0)),
        compiler_params=pltpu.CompilerParams(
            dimension_semantics=("parallel",)),                 # 2-TC sharding on v7x
        cost_estimate=pl.CostEstimate(flops=flops,
                                      transcendentals=transcendentals,
                                      bytes_accessed=bytes_accessed),
    )
    out = fn(xall, W_all, WfcT, b_fc, WoutT, b_out)
    return out[:B, :action_dim]


# --------------------------------------------------------------------------- #
# Synthetic parameter init (mirrors the PyTorch module's shapes/inits)
# --------------------------------------------------------------------------- #
def init_params(key, state_dim, action_dim, n_conv, n_fc, n_fc1):
    s_len = state_dim[1]
    keys = jax.random.split(key, 8)

    def xavier_uniform(k, shape, fan_in, fan_out):
        bound = (6.0 / (fan_in + fan_out)) ** 0.5
        return jax.random.uniform(k, shape, jnp.float32, -bound, bound)

    def xavier_normal(k, shape, fan_in, fan_out):
        std = (2.0 / (fan_in + fan_out)) ** 0.5
        return jax.random.normal(k, shape, jnp.float32) * std

    num_fc_input = (2 * n_conv * (s_len - KERNEL + 1) + 3 * n_fc
                    + n_conv * (action_dim - KERNEL + 1))
    p = {}
    p['tConv1d.weight'] = xavier_uniform(keys[0], (n_conv, 1, KERNEL), KERNEL, n_conv * KERNEL)
    p['tConv1d.bias'] = jnp.zeros((n_conv,), jnp.float32)
    p['dConv1d.weight'] = xavier_uniform(keys[1], (n_conv, 1, KERNEL), KERNEL, n_conv * KERNEL)
    p['dConv1d.bias'] = jnp.zeros((n_conv,), jnp.float32)
    p['cConv1d.weight'] = xavier_normal(keys[2], (n_conv, 1, KERNEL), KERNEL, n_conv * KERNEL)
    p['cConv1d.bias'] = jnp.zeros((n_conv,), jnp.float32)
    p['bufferFc.weight'] = xavier_uniform(keys[3], (n_fc, 1), 1, n_fc)
    p['bufferFc.bias'] = jnp.zeros((n_fc,), jnp.float32)
    p['leftChunkFc.weight'] = xavier_uniform(keys[4], (n_fc, 1), 1, n_fc)
    p['leftChunkFc.bias'] = jnp.zeros((n_fc,), jnp.float32)
    p['bitrateFc.weight'] = xavier_uniform(keys[5], (n_fc, 1), 1, n_fc)
    p['bitrateFc.bias'] = jnp.zeros((n_fc,), jnp.float32)
    p['fullyConnected.weight'] = xavier_uniform(keys[6], (n_fc1, num_fc_input), num_fc_input, n_fc1)
    p['fullyConnected.bias'] = jnp.zeros((n_fc1,), jnp.float32)
    bound = 1.0 / (n_fc1 ** 0.5)
    k_w, k_b = jax.random.split(keys[7])
    p['outputLayer.weight'] = jax.random.uniform(k_w, (action_dim, n_fc1), jnp.float32, -bound, bound)
    p['outputLayer.bias'] = jax.random.uniform(k_b, (action_dim,), jnp.float32, -bound, bound)
    return p


def reference(params, x, action_dim):
    """Pure-JAX replica of the PyTorch forward for verification."""
    relu = lambda v: jnp.maximum(v, 0.0)
    B = x.shape[0]
    br = x[:, 0:1, -1]
    bf = x[:, 1:2, -1]
    lc = x[:, 5:6, -1]
    bitrate_out = relu(br @ params['bitrateFc.weight'].T + params['bitrateFc.bias'])
    buffer_out = relu(bf @ params['bufferFc.weight'].T + params['bufferFc.bias'])
    left_out = relu(lc @ params['leftChunkFc.weight'].T + params['leftChunkFc.bias'])

    def conv1d(xs, W, b):
        Pp = xs.shape[1] - KERNEL + 1
        cols = [xs[:, p:p + KERNEL] @ W[:, 0, :].T + b for p in range(Pp)]  # each (B, n_conv)
        return relu(jnp.stack(cols, axis=-1))                               # (B, n_conv, Pp)

    t = conv1d(x[:, 2, :], params['tConv1d.weight'], params['tConv1d.bias'])
    d = conv1d(x[:, 3, :], params['dConv1d.weight'], params['dConv1d.bias'])
    c = conv1d(x[:, 4, :action_dim], params['cConv1d.weight'], params['cConv1d.bias'])
    feat = jnp.concatenate([bitrate_out, buffer_out,
                            t.reshape(B, -1), d.reshape(B, -1), c.reshape(B, -1),
                            left_out], axis=1)
    h = relu(feat @ params['fullyConnected.weight'].T + params['fullyConnected.bias'])
    logits = h @ params['outputLayer.weight'].T + params['outputLayer.bias']
    return jax.nn.softmax(logits, axis=-1)


if __name__ == "__main__":
    # small-but-consistent shapes: state = (6 channels, history 8), 6 actions.
    # (module defaults use n_conv = n_fc = n_fc1 = 128; kept at 32 for the demo)
    state_dim = (6, 8)
    action_dim = 6
    n_conv = n_fc = n_fc1 = 32
    B = 2

    key = jax.random.PRNGKey(0)
    k_params, k_x = jax.random.split(key)
    params = init_params(k_params, state_dim, action_dim, n_conv, n_fc, n_fc1)
    x = jax.random.normal(k_x, (B, state_dim[0], state_dim[1]), dtype=jnp.float32)

    # pack weights ONCE per parameter set (cached across forward calls)
    packed = pack_actor_weights(params, state_dim, action_dim)
    forward = jax.jit(functools.partial(actor_forward, action_dim=action_dim,
                                        b_tile_max=512))

    out = forward(packed, x)
    out = jax.block_until_ready(out)

    ref = reference(params, x, action_dim)
    assert out.shape == (B, action_dim)
    assert bool(jnp.allclose(jnp.sum(out, axis=-1), 1.0, atol=1e-3))
    assert bool(jnp.allclose(out, ref, atol=1e-2, rtol=1e-2))
    print("KERNEL_OK")
</pallas_src>

<mosaic_0001>
module attributes {stable_mosaic.version = 11 : i64} {
  func.func @actor_kernel(%arg0: i32, %arg1: memref<16x26xbf16, #tpu.memory_space<vmem>>, %arg2: memref<26x512xbf16, #tpu.memory_space<vmem>>, %arg3: memref<512x32xbf16, #tpu.memory_space<vmem>>, %arg4: memref<1x32xf32, #tpu.memory_space<vmem>>, %arg5: memref<32x128xbf16, #tpu.memory_space<vmem>>, %arg6: memref<1x128xf32, #tpu.memory_space<vmem>>, %arg7: memref<16x128xf32, #tpu.memory_space<vmem>>) attributes {dimension_semantics = [#tpu.dimension_semantics<parallel>], iteration_bounds = array<i64: 1>, scalar_prefetch = 0 : i64, scratch_operands = 0 : i64, tpu.core_type = #tpu.core_type<tc>, window_params = [{transform_indices = @transform_0, window_bounds = array<i64: 16, 26>}, {pipeline_mode = #tpu.pipeline_mode<synchronous>, transform_indices = @transform_1, window_bounds = array<i64: 26, 512>}, {pipeline_mode = #tpu.pipeline_mode<synchronous>, transform_indices = @transform_2, window_bounds = array<i64: 512, 32>}, {pipeline_mode = #tpu.pipeline_mode<synchronous>, transform_indices = @transform_3, window_bounds = array<i64: 1, 32>}, {pipeline_mode = #tpu.pipeline_mode<synchronous>, transform_indices = @transform_4, window_bounds = array<i64: 32, 128>}, {pipeline_mode = #tpu.pipeline_mode<synchronous>, transform_indices = @transform_5, window_bounds = array<i64: 1, 128>}, {transform_indices = @transform_6, window_bounds = array<i64: 16, 128>}]} {
    %c0 = arith.constant 0 : index
    %c0_0 = arith.constant 0 : index
    %0 = vector.load %arg1[%c0, %c0_0] : memref<16x26xbf16, #tpu.memory_space<vmem>>, vector<16x26xbf16>
    %c0_1 = arith.constant 0 : index
    %c0_2 = arith.constant 0 : index
    %1 = vector.load %arg2[%c0_1, %c0_2] : memref<26x512xbf16, #tpu.memory_space<vmem>>, vector<26x512xbf16>
    %cst = arith.constant dense<0.000000e+00> : vector<16x512xf32>
    %2 = tpu.matmul %0, %1, %cst {dimension_numbers = #tpu.dot_dimension_numbers<[1], [0], [0], [1], [0, 0, 1, 1], [], []>} : vector<16x26xbf16>, vector<26x512xbf16>, vector<16x512xf32> -> vector<16x512xf32>
    %cst_3 = arith.constant 0.000000e+00 : f32
    %3 = vector.broadcast %cst_3 : f32 to vector<16x512xf32>
    %4 = arith.maximumf %2, %3 : vector<16x512xf32>
    %5 = arith.truncf %4 : vector<16x512xf32> to vector<16x512xbf16>
    %c0_4 = arith.constant 0 : index
    %c0_5 = arith.constant 0 : index
    %6 = vector.load %arg3[%c0_4, %c0_5] : memref<512x32xbf16, #tpu.memory_space<vmem>>, vector<512x32xbf16>
    %cst_6 = arith.constant dense<0.000000e+00> : vector<16x32xf32>
    %7 = tpu.matmul %5, %6, %cst_6 {dimension_numbers = #tpu.dot_dimension_numbers<[1], [0], [0], [1], [0, 0, 1, 1], [], []>} : vector<16x512xbf16>, vector<512x32xbf16>, vector<16x32xf32> -> vector<16x32xf32>
    %c0_7 = arith.constant 0 : index
    %c0_8 = arith.constant 0 : index
    %8 = vector.load %arg4[%c0_7, %c0_8] : memref<1x32xf32, #tpu.memory_space<vmem>>, vector<1x32xf32>
    %9 = vector.broadcast %8 : vector<1x32xf32> to vector<16x32xf32>
    %10 = arith.addf %7, %9 : vector<16x32xf32>
    %cst_9 = arith.constant 0.000000e+00 : f32
    %11 = vector.broadcast %cst_9 : f32 to vector<16x32xf32>
    %12 = arith.maximumf %10, %11 : vector<16x32xf32>
    %13 = arith.truncf %12 : vector<16x32xf32> to vector<16x32xbf16>
    %c0_10 = arith.constant 0 : index
    %c0_11 = arith.constant 0 : index
    %14 = vector.load %arg5[%c0_10, %c0_11] : memref<32x128xbf16, #tpu.memory_space<vmem>>, vector<32x128xbf16>
    %cst_12 = arith.constant dense<0.000000e+00> : vector<16x128xf32>
    %15 = tpu.matmul %13, %14, %cst_12 {dimension_numbers = #tpu.dot_dimension_numbers<[1], [0], [0], [1], [0, 0, 1, 1], [], []>} : vector<16x32xbf16>, vector<32x128xbf16>, vector<16x128xf32> -> vector<16x128xf32>
    %c0_13 = arith.constant 0 : index
    %c0_14 = arith.constant 0 : index
    %16 = vector.load %arg6[%c0_13, %c0_14] : memref<1x128xf32, #tpu.memory_space<vmem>>, vector<1x128xf32>
    %17 = vector.broadcast %16 : vector<1x128xf32> to vector<16x128xf32>
    %18 = arith.addf %15, %17 : vector<16x128xf32>
    %cst_15 = arith.constant dense<0xFF800000> : vector<16xf32>
    %19 = vector.multi_reduction <maximumf>, %18, %cst_15 [1] : vector<16x128xf32> to vector<16xf32>
    %20 = vector.shape_cast %19 : vector<16xf32> to vector<16x1xf32>
    %21 = vector.broadcast %20 : vector<16x1xf32> to vector<16x128xf32>
    %22 = arith.subf %18, %21 : vector<16x128xf32>
    %23 = math.exp %22 : vector<16x128xf32>
    %cst_16 = arith.constant dense<0.000000e+00> : vector<16xf32>
    %24 = vector.multi_reduction <add>, %23, %cst_16 [1] : vector<16x128xf32> to vector<16xf32>
    %25 = vector.shape_cast %24 : vector<16xf32> to vector<16x1xf32>
    %26 = tpu.reciprocal %25 {approx = true} : vector<16x1xf32> -> vector<16x1xf32>
    %27 = vector.broadcast %26 : vector<16x1xf32> to vector<16x128xf32>
    %28 = arith.mulf %23, %27 : vector<16x128xf32>
    %c0_17 = arith.constant 0 : index
    %c0_18 = arith.constant 0 : index
    %29 = vector.load %arg7[%c0_17, %c0_18] : memref<16x128xf32, #tpu.memory_space<vmem>>, vector<16x128xf32>
    tpu.vector_store %arg7[%c0_17, %c0_18], %28 {strides = array<i32>} : memref<16x128xf32, #tpu.memory_space<vmem>>, vector<16x128xf32>,
    return
  }
  func.func @transform_0(%arg0: i32) -> (i32, i32) {
    %c0_i32 = arith.constant 0 : i32
    %c0_i32_0 = arith.constant 0 : i32
    return %arg0, %c0_i32 : i32, i32
  }
  func.func @transform_1(%arg0: i32) -> (i32, i32) {
    %c0_i32 = arith.constant 0 : i32
    %c0_i32_0 = arith.constant 0 : i32
    %c0_i32_1 = arith.constant 0 : i32
    return %c0_i32, %c0_i32_0 : i32, i32
  }
  func.func @transform_2(%arg0: i32) -> (i32, i32) {
    %c0_i32 = arith.constant 0 : i32
    %c0_i32_0 = arith.constant 0 : i32
    %c0_i32_1 = arith.constant 0 : i32
    return %c0_i32, %c0_i32_0 : i32, i32
  }
  func.func @transform_3(%arg0: i32) -> (i32, i32) {
    %c0_i32 = arith.constant 0 : i32
    %c0_i32_0 = arith.constant 0 : i32
    %c0_i32_1 = arith.constant 0 : i32
    return %c0_i32, %c0_i32_0 : i32, i32
  }
  func.func @transform_4(%arg0: i32) -> (i32, i32) {
    %c0_i32 = arith.constant 0 : i32
    %c0_i32_0 = arith.constant 0 : i32
    %c0_i32_1 = arith.constant 0 : i32
    return %c0_i32, %c0_i32_0 : i32, i32
  }
  func.func @transform_5(%arg0: i32) -> (i32, i32) {
    %c0_i32 = arith.constant 0 : i32
    %c0_i32_0 = arith.constant 0 : i32
    %c0_i32_1 = arith.constant 0 : i32
    return %c0_i32, %c0_i32_0 : i32, i32
  }
  func.func @transform_6(%arg0: i32) -> (i32, i32) {
    %c0_i32 = arith.constant 0 : i32
    %c0_i32_0 = arith.constant 0 : i32
    return %arg0, %c0_i32 : i32, i32
  }
}

</mosaic_0001>

<bundles_post_ra>
// kernel: actor_forward.1
= control target key start
LH: loop header
LB: loop body
LE: loop exit
PB: predicated region body
PF: predicated region fallthrough
CT: control target
= control target key end

     0   :  { %vm79_vm0 = vcmask 1044480   ;;  %vm75_vm1 = vcmask 211968   ;;  %vm499_vm2 = vcmask 261120   ;;  %s975_s1 = inlined_call_operand.vmem [shape: bf16[26,512], index: 1, kind: input, shape index: {}]   ;;  %s976_s2 = inlined_call_operand.vmem [shape: bf16[512,32], index: 2, kind: input, shape index: {}]   ;;  %s977_s0 = inlined_call_operand.vmem [shape: bf16[16,26], index: 0, kind: input, shape index: {}]   ;;  %s978_s3 = inlined_call_operand.vmem [shape: f32[1,32], index: 3, kind: input, shape index: {}]   ;;  %s979_s5 = inlined_call_operand.vmem [shape: f32[1,128], index: 5, kind: input, shape index: {}]   ;;  %s980_s4 = inlined_call_operand.vmem [shape: bf16[32,128], index: 4, kind: input, shape index: {}]   ;;  %s981_s6 = inlined_call_operand.vmem [shape: f32[16,128], index: 6, kind: output, shape index: {}]  }
   0x1   :  { %v563_v0 = vld [vmem:[%s975_s1 + $0x20] sm:$0xf]  ;;  %v725_v1 = vld [vmem:[%s975_s1 + $0x2c] sm:$0x10]  ;;  %v723_v2 = vld [vmem:[%s975_s1 + $0x24] sm:$0xf] }
   0x2   :  { %v564_v3 = vor.u32 %v725_v1, %v563_v0  ;;  %v565_v4 = vld [vmem:[%s975_s1 + $0x30] sm:$0x10]  ;;  %v571_v5 = vld [vmem:[%s975_s1 + $0x28] sm:$0xf]  ;;  %v726_v6 = vld [vmem:[%s975_s1 + $0x34] sm:$0x10] }
   0x3   :  { %v568_v7 = vor.u32 %v723_v2, %v565_v4  ;;  %v572_v8 = vor.u32 %v726_v6, %v571_v5  ;;  %v724_v9 = vld [vmem:[%s975_s1 + $0x2c] sm:$0xf]  ;;  %v573_v10 = vld [vmem:[%s975_s1 + $0x38] sm:$0x10]  ;;  %v547_v11 = vld [vmem:[%s975_s1] sm:$0xf] }
   0x4   :  { %v81_v12 = vsel %vm79_vm0, %v564_v3, 0  ;;  %v576_v13 = vor.u32 %v724_v9, %v573_v10  ;;  %v721_v14 = vld [vmem:[%s975_s1 + $0xc] sm:$0xf0]  ;;  %v719_v15 = vld [vmem:[%s975_s1 + $0x4] sm:$0xf]  ;;  %v734_v27 = vld [vmem:[%s976_s2 + $0x38] sm:$0xff] }
   0x5   :  { %98 = vmatpush.bf16.msra.mxu0 %v81_v12  ;;  %v84_v16 = vsel %vm79_vm0, %v568_v7, 0  ;;  %v87_v17 = vsel %vm79_vm0, %v572_v8, 0  ;;  %v548_v18 = vor.u32 %v721_v14, %v547_v11  ;;  %v549_v19 = vld [vmem:[%s975_s1 + $0x10] sm:$0xf0]  ;;  %v555_v20 = vld [vmem:[%s975_s1 + $0x8] sm:$0xf] }
   0x6   :  { %112 = vmatpush.bf16.msra.mxu1 %v84_v16  ;;  %126 = vmatpush.bf16.msra.mxu2 %v87_v17  ;;  %v90_v21 = vsel %vm79_vm0, %v576_v13, 0  ;;  %v552_v22 = vor.u32 %v719_v15, %v549_v19  ;;  %v722_v23 = vld [vmem:[%s975_s1 + $0x14] sm:$0xf0]  ;;  %v720_v24 = vld [vmem:[%s975_s1 + $0xc] sm:$0xf]  ;;  %v718_v29 = vld [vmem:[%s977_s0] sm:$0xff] }
   0x7   :  { %140 = vmatpush.bf16.msra.mxu3 %v90_v21  ;;  %v556_v25 = vor.u32 %v722_v23, %v555_v20  ;;  %v557_v26 = vld [vmem:[%s975_s1 + $0x18] sm:$0xf0]  ;;  %v733_v32 = vld [vmem:[%s976_s2 + $0x30] sm:$0xff]  ;;  %v732_v36 = vld [vmem:[%s976_s2 + $0x28] sm:$0xff] }
   0x8   :  { %v560_v28 = vor.u32 %v720_v24, %v557_v26  ;;  %v742_v30 = vld [vmem:[%s976_s2 + $0x78] sm:$0xff]  ;;  %v741_v34 = vld [vmem:[%s976_s2 + $0x70] sm:$0xff]  ;;  %v740_v38 = vld [vmem:[%s976_s2 + $0x68] sm:$0xff] }
   0x9   :  { %99 = vmatpush.bf16.msra.mxu0 %v548_v18  ;;  %v750_v31 = vld [vmem:[%s976_s2 + $0xb8] sm:$0xff]  ;;  %v749_v35 = vld [vmem:[%s976_s2 + $0xb0] sm:$0xff]  ;;  %v748_v39 = vld [vmem:[%s976_s2 + $0xa8] sm:$0xff] }
   0xa   :  { %113 = vmatpush.bf16.msra.mxu1 %v552_v22  ;;  %127 = vmatpush.bf16.msra.mxu2 %v556_v25  ;;  %v758_v33 = vld [vmem:[%s976_s2 + $0xf8] sm:$0xff]  ;;  %v757_v37 = vld [vmem:[%s976_s2 + $0xf0] sm:$0xff]  ;;  %v731_v40 = vld [vmem:[%s976_s2 + $0x20] sm:$0xff] }
   0xb   :  { %141 = vmatpush.bf16.msra.mxu3 %v560_v28  ;;  %v756_v41 = vld [vmem:[%s976_s2 + $0xe8] sm:$0xff]  ;;  %v739_v42 = vld [vmem:[%s976_s2 + $0x60] sm:$0xff]  ;;  %v730_v43 = vld [vmem:[%s976_s2 + $0x18] sm:$0xff] }
   0xc   :  { %577 = vmatmul.msk.bf16.vlgmr.msra.gmra.mxu0 %vm75_vm1, %v718_v29  ;;  %v738_v44 = vld [vmem:[%s976_s2 + $0x58] sm:$0xff]  ;;  %v747_v45 = vld [vmem:[%s976_s2 + $0xa0] sm:$0xff]  ;;  %v729_v47 = vld [vmem:[%s976_s2 + $0x10] sm:$0xff] }
   0xd   :  { %420 = vmatpush.bf16.msrb.mxu0 %v734_v27  ;;  %578 = vmatmul.msk.bf16.vlgmr.msra.gmra.mxu1 %vm75_vm1, %v718_v29  ;;  %v755_v46 = vld [vmem:[%s976_s2 + $0xe0] sm:$0xff]  ;;  %v737_v48 = vld [vmem:[%s976_s2 + $0x50] sm:$0xff]  ;;  %v746_v49 = vld [vmem:[%s976_s2 + $0x98] sm:$0xff] }
   0xe   :  { %434 = vmatpush.bf16.msrb.mxu1 %v742_v30  ;;  %579 = vmatmul.msk.bf16.vlgmr.msra.gmra.mxu2 %vm75_vm1, %v718_v29  ;;  %v754_v50 = vld [vmem:[%s976_s2 + $0xd8] sm:$0xff]  ;;  %v728_v51 = vld [vmem:[%s976_s2 + $0x8] sm:$0xff]  ;;  %v745_v53 = vld [vmem:[%s976_s2 + $0x90] sm:$0xff] }
   0xf   :  { %580 = vmatmul.msk.bf16.vlgmr.msra.gmra.mxu3 %vm75_vm1, %v718_v29  ;;  %448 = vmatpush.bf16.msrb.mxu2 %v750_v31  ;;  %v736_v52 = vld [vmem:[%s976_s2 + $0x48] sm:$0xff]  ;;  %v753_v54 = vld [vmem:[%s976_s2 + $0xd0] sm:$0xff]  ;;  %v727_v55 = vld [vmem:[%s976_s2] sm:$0xff] }
  0x10   :  { %462 = vmatpush.bf16.msrb.mxu3 %v758_v33  ;;  %v735_v56 = vld [vmem:[%s976_s2 + $0x40] sm:$0xff]  ;;  %v744_v57 = vld [vmem:[%s976_s2 + $0x88] sm:$0xff] }
  0x11   :  { %421 = vmatpush.bf16.msrb.mxu0 %v733_v32  ;;  %v752_v58 = vld [vmem:[%s976_s2 + $0xc8] sm:$0xff]  ;;  %v743_v59 = vld [vmem:[%s976_s2 + $0x80] sm:$0xff] }
  0x12   :  { %435 = vmatpush.bf16.msrb.mxu1 %v741_v34  ;;  %v751_v60 = vld [vmem:[%s976_s2 + $0xc0] sm:$0xff]  ;;  %v760_v17 = vld [vmem:[%s980_s4 + $0x8] sm:$0xff] }
  0x13   :  { %449 = vmatpush.bf16.msrb.mxu2 %v749_v35  ;;  %v759_v18 = vld [vmem:[%s980_s4] sm:$0xff] }
  0x14   :  { %463 = vmatpush.bf16.msrb.mxu3 %v757_v37  ;;  %v761_v20 = vld [vmem:[%s978_s3] ss:$0 sm:$0xff] }
  0x15   :  { %422 = vmatpush.bf16.msrb.mxu0 %v732_v36 }
  0x16   :  { %436 = vmatpush.bf16.msrb.mxu1 %v740_v38 }
  0x17   :  { %450 = vmatpush.bf16.msrb.mxu2 %v748_v39  ;;  %v762_v39 = vld [vmem:[%s979_s5] ss:$0 sm:$0xff] }
  0x18   :  { %464 = vmatpush.bf16.msrb.mxu3 %v756_v41 }
  0x19   :  { %423 = vmatpush.bf16.msrb.mxu0 %v731_v40 }
  0x1a   :  { %437 = vmatpush.bf16.msrb.mxu1 %v739_v42 }
  0x1b   :  { %451 = vmatpush.bf16.msrb.mxu2 %v747_v45 }
  0x1c   :  { %465 = vmatpush.bf16.msrb.mxu3 %v755_v46 }
  0x1d   :  { %424 = vmatpush.bf16.msrb.mxu0 %v730_v43 }
  0x1e   :  { %438 = vmatpush.bf16.msrb.mxu1 %v738_v44 }
  0x1f   :  { %452 = vmatpush.bf16.msrb.mxu2 %v746_v49 }
  0x20   :  { %466 = vmatpush.bf16.msrb.mxu3 %v754_v50 }
  0x21   :  { %425 = vmatpush.bf16.msrb.mxu0 %v729_v47 }
  0x22   :  { %439 = vmatpush.bf16.msrb.mxu1 %v737_v48 }
  0x23   :  { %453 = vmatpush.bf16.msrb.mxu2 %v745_v53 }
  0x24   :  { %467 = vmatpush.bf16.msrb.mxu3 %v753_v54 }
  0x25   :  { %426 = vmatpush.bf16.msrb.mxu0 %v728_v51 }
  0x26   :  { %440 = vmatpush.bf16.msrb.mxu1 %v736_v52 }
  0x27   :  { %454 = vmatpush.bf16.msrb.mxu2 %v744_v57 }
  0x28   :  { %468 = vmatpush.bf16.msrb.mxu3 %v752_v58 }
  0x29   :  { %427 = vmatpush.bf16.msrb.mxu0 %v727_v55 }
  0x2a   :  { %441 = vmatpush.bf16.msrb.mxu1 %v735_v56 }
  0x2b   :  { %455 = vmatpush.bf16.msrb.mxu2 %v743_v59 }
  0x2c   :  { %469 = vmatpush.bf16.msrb.mxu3 %v751_v60 }
  0x2d   :  { %509 = vmatpush.bf16.msra.mxu0 %v760_v17 }
  0x31   :  { %510 = vmatpush.bf16.msra.mxu0 %v759_v18 }
  0x89   :  { %v101_v61 = vpop.f32.mrf.mxu0 }
  0x8a   :  { %v115_v62 = vpop.f32.mrf.mxu1  ;;  %v148_v63 = vmax.f32 %v101_v61, 0.0 }
  0x8b   :  { %v149_v1 = vmax.f32 %v115_v62, 0.0 }
  0x91   :  { %v129_v0 = vpop.f32.mrf.mxu2  ;;  %v103_v3 = vpop.f32.mrf.mxu0 }
  0x92   :  { %v143_v2 = vpop.f32.mrf.mxu3  ;;  %v152_v4 = vmax.f32 %v103_v3, 0.0  ;;  %v117_v5 = vpop.f32.mrf.mxu1  ;;  %v150_v10 = vmax.f32 %v129_v0, 0.0 }
  0x93   :  { %v153_v6 = vmax.f32 %v117_v5, 0.0  ;;  %v151_v13 = vmax.f32 %v143_v2, 0.0 }
  0x94   :  { %v156_v7 = vpack.c.bf16 %v152_v4, %v148_v63 }
  0x95   :  { %v157_v8 = vpack.c.bf16 %v153_v6, %v149_v1 }
  0x96   :  { %428 = vmatmul.bf16.vlgmr.msrb.gmra.mxu0 %v156_v7 }
  0x97   :  { %442 = vmatmul.bf16.vlgmr.msrb.gmra.mxu1 %v157_v8 }
  0x99   :  { %v131_v9 = vpop.f32.mrf.mxu2 }
  0x9a   :  { %v154_v11 = vmax.f32 %v131_v9, 0.0  ;;  %v145_v12 = vpop.f32.mrf.mxu3 }
  0x9b   :  { %v155_v14 = vmax.f32 %v145_v12, 0.0 }
  0x9c   :  { %v158_v15 = vpack.c.bf16 %v154_v11, %v150_v10 }
  0x9d   :  { %v159_v16 = vpack.c.bf16 %v155_v14, %v151_v13 }
  0x9e   :  { %456 = vmatmul.bf16.vlgmr.msrb.gmra.mxu2 %v158_v15 }
  0x9f   :  { %470 = vmatmul.bf16.vlgmr.msrb.gmra.mxu3 %v159_v16 }
 0x113   :  { %v429_v19 = vpop.f32.mrf.mxu0 }
 0x114   :  { %v443_v21 = vpop.f32.mrf.mxu1  ;;  %v430_v22 = vadd.f32 %v761_v20, %v429_v19 }
 0x116   :  { %v444_v26 = vadd.f32 %v443_v21, %v430_v22 }
 0x11b   :  { %v431_v23 = vpop.f32.mrf.mxu0 }
 0x11c   :  { %v432_v27 = vadd.f32 %v761_v20, %v431_v23  ;;  %v445_v29 = vpop.f32.mrf.mxu1 }
 0x11e   :  { %v446_v30 = vadd.f32 %v445_v29, %v432_v27 }
 0x121   :  { %v457_v24 = vpop.f32.mrf.mxu2 }
 0x122   :  { %v471_v25 = vpop.f32.mrf.mxu3  ;;  %v458_v28 = vadd.f32 %v457_v24, %v444_v26 }
 0x124   :  { %v472_v32 = vadd.f32 %v471_v25, %v458_v28 }
 0x126   :  { %v476_v36 = vmax.f32 %v472_v32, 0.0 }
 0x129   :  { %v459_v31 = vpop.f32.mrf.mxu2 }
 0x12a   :  { %v460_v33 = vadd.f32 %v459_v31, %v446_v30  ;;  %v473_v34 = vpop.f32.mrf.mxu3 }
 0x12c   :  { %v474_v35 = vadd.f32 %v473_v34, %v460_v33 }
 0x12e   :  { %v477_v37 = vmax.f32 %v474_v35, 0.0 }
 0x130   :  { %v478_v38 = vpack.c.bf16 %v477_v37, %v476_v36 }
 0x132   :  { %717 = vmatmul.msk.bf16.vlgmr.msra.gmra.mxu0 %vm499_vm2, %v478_v38 }
 0x1af   :  { %v512_v40 = vpop.f32.mrf.mxu0 }
 0x1b0   :  { %v513_v41 = vadd.f32 %v762_v39, %v512_v40 }
 0x1b2   :  { %517 = vmax.xlane.f32.xlu0 %v513_v41 }
 0x1b7   :  { %v514_v42 = vpop.f32.mrf.mxu0 }
 0x1b8   :  { %v515_v43 = vadd.f32 %v762_v39, %v514_v42 }
 0x1ba   :  { %519 = vmax.xlane.f32.xlu0 %v515_v43 }
 0x225   :  { %v518_v44 = vpop.xlane.xlu0 %517 }
 0x226   :  { %v521_v45 = vsub.f32 %v513_v41, %v518_v44 }
 0x228   :  { %v523_v46 = vmul.f32 1.442695, %v521_v45 }
 0x22a   :  { %763 = vpow2.f32 %v523_v46 }
 0x22d   :  { %v520_v47 = vpop.xlane.xlu0 %519 }
 0x22e   :  { %v522_v48 = vsub.f32 %v515_v43, %v520_v47 }
 0x230   :  { %v764_v49 = vpop.eup %763  ;;  %v525_v50 = vmul.f32 1.442695, %v522_v48 }
 0x231   :  { %527 = vadd.xlane.f32.xlu1 %v764_v49 }
 0x232   :  { %765 = vpow2.f32 %v525_v50 }
 0x238   :  { %v766_v51 = vpop.eup %765 }
 0x239   :  { %529 = vadd.xlane.f32.xlu1 %v766_v51 }
 0x2a4   :  { %v528_v52 = vpop.xlane.xlu1 %527 }
 0x2a5   :  { %767 = vrcp.f32 %v528_v52 }
 0x2ab   :  { %v768_v53 = vpop.eup %767 }
 0x2ac   :  { %v533_v54 = vmul.f32 %v768_v53, %v764_v49  ;;  %v530_v55 = vpop.xlane.xlu1 %529 }
 0x2ad   :  { %769 = vrcp.f32 %v530_v55 }
 0x2ae   :  { %535 = vst [vmem:[%s981_s6] sm:$0xff] %v533_v54 }
 0x2b3   :  { %v770_v56 = vpop.eup %769 }
 0x2b4   :  { %v534_v57 = vmul.f32 %v770_v56, %v766_v51 }
 0x2b6   :  { %536 = vst [vmem:[%s981_s6 + $0x8] sm:$0xff] %v534_v57 }

</bundles_post_ra>
